<compile_context>
chip_gen: v5e
topology: v5e:2x2
jax: 0.10.0
libtpu: 0.0.40
codegen_flags: <defaults>
</compile_context>

<pallas_src>
import functools

import numpy as np

import jax
import jax.numpy as jnp
from jax.experimental import pallas as pl
from jax.experimental.pallas import tpu as pltpu


def _round_up(x: int, m: int) -> int:
    return ((x + m - 1) // m) * m


def _cdiv(a: int, b: int) -> int:
    return -(-a // b)


def _vmem_capacity_bytes() -> int:
    """Physical per-core VMEM; fall back to a conservative 64 MiB (v7x)."""
    try:
        return int(pltpu.get_tpu_info().vmem_capacity_bytes)
    except Exception:
        return 64 << 20


def _netg_kernel(x_ref, w_ref, b_ref, out_ref):
    # x_ref: (tm, L1) f32/bf16, w_ref: (L1, tn) f32/bf16, b_ref: (1, tn) f32.
    z = jnp.dot(x_ref[...], w_ref[...], preferred_element_type=jnp.float32)
    z = z + b_ref[...]                                   # bias broadcast, f32
    # Numerically stable softplus: max(z, 0) + log1p(exp(-|z|))  (VPU + EUP).
    sp = jnp.maximum(z, 0.0) + jnp.log1p(jnp.exp(-jnp.abs(z)))
    out_ref[...] = sp.astype(out_ref.dtype)


def _build_and_run(x_in, w_in, b_in, *, N, L1, L2, tm, tn, n_row, n_col,
                   out_dtype, vmem_limit, single_buffer_weights):
    rep_kwargs = {}
    if single_buffer_weights:
        # w1 / b1 index_maps are grid-invariant here (n_col == 1): one buffer
        # suffices, halving their VMEM footprint vs. default double-buffering.
        rep_kwargs = dict(pipeline_mode=pl.Buffered(1))

    cost = pl.CostEstimate(
        flops=2 * N * L1 * L2,
        transcendentals=2 * N * L2,  # exp + log1p per output element
        bytes_accessed=(x_in.size * x_in.dtype.itemsize
                        + w_in.size * w_in.dtype.itemsize
                        + b_in.size * b_in.dtype.itemsize
                        + N * L2 * np.dtype(out_dtype).itemsize),
    )

    out = pl.pallas_call(
        _netg_kernel,
        out_shape=jax.ShapeDtypeStruct((N, L2), out_dtype),
        grid_spec=pltpu.PrefetchScalarGridSpec(
            num_scalar_prefetch=0,
            grid=(n_row, n_col),
            in_specs=[
                pl.BlockSpec((tm, L1), lambda i, j: (i, 0)),                # x: row-tiled
                pl.BlockSpec((L1, tn), lambda i, j: (0, j), **rep_kwargs),  # w1
                pl.BlockSpec((1, tn), lambda i, j: (0, j), **rep_kwargs),   # b1 (f32)
            ],
            out_specs=pl.BlockSpec((tm, tn), lambda i, j: (i, j)),          # lane-dense
        ),
        compiler_params=pltpu.CompilerParams(
            dimension_semantics=("parallel", "parallel"),
            vmem_limit_bytes=vmem_limit),
        cost_estimate=cost,
    )(x_in, w_in, b_in)
    # Block here so any async runtime error surfaces inside the caller's try.
    return jax.block_until_ready(out)


def netg_onelayer_forward(x, w1, b1, *, tm=2048, tn=1024,
                          use_bf16_mxu=False, out_dtype=jnp.float32):
    """Pallas forward of netG_onelayer: softplus(x @ w1 + b1) -> [N, L2].

    tm / tn are caps on the row / column tiles; actual tiles are derived from
    the VMEM budget. use_bf16_mxu=True streams x and w1 as bf16 from HBM
    (f32 accumulate + f32 softplus); out_dtype=bf16 halves the writeback.
    """
    N, L1 = x.shape
    L2 = w1.shape[1]
    assert w1.shape[0] == L1 and b1.shape == (1, L2)

    # bf16 cast happens HERE (wrapper) so HBM traffic itself is halved;
    # casting inside the kernel would leave the DMA streams at full f32.
    if use_bf16_mxu:
        x_in = x.astype(jnp.bfloat16)
        w_in = w1.astype(jnp.bfloat16)
    else:
        x_in, w_in = x, w1
    b_in = b1.astype(jnp.float32)           # tiny; keep the epilogue in f32

    x_isz = x_in.dtype.itemsize
    w_isz = w_in.dtype.itemsize
    o_isz = np.dtype(out_dtype).itemsize

    # ---- VMEM budget -> tile sizes ------------------------------------------
    cap = _vmem_capacity_bytes()                 # 64 MiB (v7x) .. 128 MiB (v5e/v6e)
    vmem_limit = min(cap * 3 // 4, 96 << 20)     # raised scoped limit w/ headroom
    tile_budget = vmem_limit - (4 << 20)         # room for Mosaic internals

    # Column tile: full L2 when small, else a lane-dense multiple of 256
    # (v6e/v7x MXU width; always a multiple of the 128-lane vreg width).
    if L2 <= max(tn, 128):
        tn_eff, n_col = L2, 1
    else:
        gran = 256 if tn >= 256 else 128
        tn_eff = max(gran, (tn // gran) * gran)
        # Keep a (worst-case double-buffered) weight block within half the budget.
        while tn_eff > gran and 2 * L1 * tn_eff * w_isz > tile_budget // 2:
            tn_eff //= 2
        n_col = _cdiv(L2, tn_eff)

    # Row tile from the remaining budget (weight conservatively counted at 2
    # buffers; x and out double-buffered by the pipeline).
    bytes_fixed = 2 * L1 * tn_eff * w_isz + 2 * 8 * tn_eff * 4
    bytes_per_row = 2 * L1 * x_isz + 2 * tn_eff * o_isz
    tm_budget = max(8, ((tile_budget - bytes_fixed) // max(bytes_per_row, 1)) // 8 * 8)
    tm_eff = min(_round_up(max(tm, 8), 8), tm_budget, _round_up(N, 8))
    # Ensure >=2 "parallel" batch steps when N allows, so v7x's 2 TensorCores
    # both get work (costs one extra ~0.35us step on single-TC chips).
    if _round_up(N, 8) >= 16 and tm_eff >= _round_up(N, 8):
        tm_eff = _round_up(_cdiv(N, 2), 8)
    n_row = _cdiv(N, tm_eff)
    # NOTE: no jnp.pad / out-slice anywhere: the cdiv grid lets Pallas mask the
    # ragged last block, so padded rows/cols are never written back to HBM.

    run = functools.partial(
        _build_and_run, x_in, w_in, b_in, N=N, L1=L1, L2=L2,
        tm=tm_eff, tn=tn_eff, n_row=n_row, n_col=n_col,
        out_dtype=out_dtype, vmem_limit=vmem_limit)

    want_single_buffer = (n_col == 1) and hasattr(pl, "Buffered")
    if not want_single_buffer:
        return run(single_buffer_weights=False)
    try:
        return run(single_buffer_weights=True)
    except Exception:
        # Some builds may reject buffer_count=1; fall back to default buffering.
        return run(single_buffer_weights=False)


def _init_params(key, L1, L2):
    """Mimics initializationhelper: uniform(-0.1, 0.1) for weight and bias."""
    k1, k2 = jax.random.split(key)
    c = 0.1
    w1 = jax.random.uniform(k1, (L1, L2), jnp.float32, -c, c)
    b1 = jax.random.uniform(k2, (1, L2), jnp.float32, -c, c)
    return w1, b1


if __name__ == "__main__":
    # Small shapes consistent with the module: inp [N, L1] -> output [N, L2].
    N, L1, L2 = 16, 32, 128
    # TODO(synk): the `if not type(inp) == Variable: inp = Variable(inp[0])`
    # input-unwrapping branch is host-side Python plumbing, not kernel work.

    key = jax.random.PRNGKey(0)
    kx, kp, kp2 = jax.random.split(key, 3)
    x = jax.random.normal(kx, (N, L1), jnp.float32)
    w1, b1 = _init_params(kp, L1, L2)

    # Exact f32 path.
    out = netg_onelayer_forward(x, w1, b1)
    jax.block_until_ready(out)
    out_ref = jax.nn.softplus(x @ w1 + b1)
    assert out.shape == (N, L2)
    assert jnp.allclose(out, out_ref, atol=1e-5), float(jnp.max(jnp.abs(out - out_ref)))

    # Ragged batch (not a multiple of 8): exercises the masked last row block
    # (no jnp.pad of x, no slicing of the output).
    x_ragged = jax.random.normal(kx, (13, L1), jnp.float32)
    out_r = netg_onelayer_forward(x_ragged, w1, b1)
    assert jnp.allclose(out_r, jax.nn.softplus(x_ragged @ w1 + b1), atol=1e-5)

    # Column-tiled path (L2 split into lane-dense tn blocks), still exact f32.
    L2b = 512
    w1b, b1b = _init_params(kp2, L1, L2b)
    out_c = netg_onelayer_forward(x, w1b, b1b, tn=128)
    assert jnp.allclose(out_c, jax.nn.softplus(x @ w1b + b1b), atol=1e-5)

    # bf16-operand path: x / w1 cast in the wrapper (halves input HBM traffic);
    # bf16 operands change numerics by ~1e-2 relative, hence loose tolerance.
    out_bf16 = netg_onelayer_forward(x, w1, b1, use_bf16_mxu=True)
    assert jnp.allclose(out_bf16, out_ref, atol=3e-2, rtol=3e-2)

    print("KERNEL_OK")
</pallas_src>

<mosaic_0001>
module attributes {stable_mosaic.version = 11 : i64} {
  func.func @_netg_kernel(%arg0: i32, %arg1: i32, %arg2: memref<8x32xf32, #tpu.memory_space<vmem>>, %arg3: memref<32x128xf32, #tpu.memory_space<vmem>>, %arg4: memref<1x128xf32, #tpu.memory_space<vmem>>, %arg5: memref<8x128xf32, #tpu.memory_space<vmem>>) attributes {dimension_semantics = [#tpu.dimension_semantics<parallel>, #tpu.dimension_semantics<parallel>], iteration_bounds = array<i64: 2, 1>, scalar_prefetch = 0 : i64, scratch_operands = 0 : i64, tpu.core_type = #tpu.core_type<tc>, window_params = [{transform_indices = @transform_0, window_bounds = array<i64: 8, 32>}, {pipeline_mode = #tpu.pipeline_mode<synchronous>, transform_indices = @transform_1, window_bounds = array<i64: 32, 128>}, {pipeline_mode = #tpu.pipeline_mode<synchronous>, transform_indices = @transform_2, window_bounds = array<i64: 1, 128>}, {transform_indices = @transform_3, window_bounds = array<i64: 8, 128>}]} {
    %c0 = arith.constant 0 : index
    %c0_0 = arith.constant 0 : index
    %0 = vector.load %arg2[%c0, %c0_0] : memref<8x32xf32, #tpu.memory_space<vmem>>, vector<8x32xf32>
    %c0_1 = arith.constant 0 : index
    %c0_2 = arith.constant 0 : index
    %1 = vector.load %arg3[%c0_1, %c0_2] : memref<32x128xf32, #tpu.memory_space<vmem>>, vector<32x128xf32>
    %cst = arith.constant dense<0.000000e+00> : vector<8x128xf32>
    %2 = tpu.matmul %0, %1, %cst {dimension_numbers = #tpu.dot_dimension_numbers<[1], [0], [0], [1], [0, 0, 1, 1], [], []>} : vector<8x32xf32>, vector<32x128xf32>, vector<8x128xf32> -> vector<8x128xf32>
    %c0_3 = arith.constant 0 : index
    %c0_4 = arith.constant 0 : index
    %3 = vector.load %arg4[%c0_3, %c0_4] : memref<1x128xf32, #tpu.memory_space<vmem>>, vector<1x128xf32>
    %4 = vector.broadcast %3 : vector<1x128xf32> to vector<8x128xf32>
    %5 = arith.addf %2, %4 : vector<8x128xf32>
    %cst_5 = arith.constant 0.000000e+00 : f32
    %6 = vector.broadcast %cst_5 : f32 to vector<8x128xf32>
    %7 = arith.maximumf %5, %6 : vector<8x128xf32>
    %8 = math.absf %5 : vector<8x128xf32>
    %cst_6 = arith.constant 0.000000e+00 : f32
    %9 = vector.broadcast %cst_6 : f32 to vector<8x128xf32>
    %10 = arith.subf %9, %8 : vector<8x128xf32>
    %11 = math.exp %10 : vector<8x128xf32>
    %12 = math.log1p %11 : vector<8x128xf32>
    %13 = arith.addf %7, %12 : vector<8x128xf32>
    %c0_7 = arith.constant 0 : index
    %c0_8 = arith.constant 0 : index
    %14 = vector.load %arg5[%c0_7, %c0_8] : memref<8x128xf32, #tpu.memory_space<vmem>>, vector<8x128xf32>
    tpu.vector_store %arg5[%c0_7, %c0_8], %13 {strides = array<i32>} : memref<8x128xf32, #tpu.memory_space<vmem>>, vector<8x128xf32>,
    return
  }
  func.func @transform_0(%arg0: i32, %arg1: i32) -> (i32, i32) {
    %c0_i32 = arith.constant 0 : i32
    %c0_i32_0 = arith.constant 0 : i32
    return %arg0, %c0_i32 : i32, i32
  }
  func.func @transform_1(%arg0: i32, %arg1: i32) -> (i32, i32) {
    %c0_i32 = arith.constant 0 : i32
    %c0_i32_0 = arith.constant 0 : i32
    return %c0_i32, %arg1 : i32, i32
  }
  func.func @transform_2(%arg0: i32, %arg1: i32) -> (i32, i32) {
    %c0_i32 = arith.constant 0 : i32
    %c0_i32_0 = arith.constant 0 : i32
    return %c0_i32, %arg1 : i32, i32
  }
  func.func @transform_3(%arg0: i32, %arg1: i32) -> (i32, i32) {
    %c0_i32 = arith.constant 0 : i32
    return %arg0, %arg1 : i32, i32
  }
}

module attributes {stable_mosaic.version = 11 : i64} {
  func.func @_netg_kernel(%arg0: i32, %arg1: i32, %arg2: memref<8x32xf32, #tpu.memory_space<vmem>>, %arg3: memref<32x128xf32, #tpu.memory_space<vmem>>, %arg4: memref<1x128xf32, #tpu.memory_space<vmem>>, %arg5: memref<8x128xf32, #tpu.memory_space<vmem>>) attributes {dimension_semantics = [#tpu.dimension_semantics<parallel>, #tpu.dimension_semantics<parallel>], iteration_bounds = array<i64: 2, 1>, scalar_prefetch = 0 : i64, scratch_operands = 0 : i64, tpu.core_type = #tpu.core_type<tc>, window_params = [{transform_indices = @transform_0, window_bounds = array<i64: 8, 32>}, {transform_indices = @transform_1, window_bounds = array<i64: 32, 128>}, {transform_indices = @transform_2, window_bounds = array<i64: 1, 128>}, {transform_indices = @transform_3, window_bounds = array<i64: 8, 128>}]} {
    %c0 = arith.constant 0 : index
    %c0_0 = arith.constant 0 : index
    %0 = vector.load %arg2[%c0, %c0_0] : memref<8x32xf32, #tpu.memory_space<vmem>>, vector<8x32xf32>
    %c0_1 = arith.constant 0 : index
    %c0_2 = arith.constant 0 : index
    %1 = vector.load %arg3[%c0_1, %c0_2] : memref<32x128xf32, #tpu.memory_space<vmem>>, vector<32x128xf32>
    %cst = arith.constant dense<0.000000e+00> : vector<8x128xf32>
    %2 = tpu.matmul %0, %1, %cst {dimension_numbers = #tpu.dot_dimension_numbers<[1], [0], [0], [1], [0, 0, 1, 1], [], []>} : vector<8x32xf32>, vector<32x128xf32>, vector<8x128xf32> -> vector<8x128xf32>
    %c0_3 = arith.constant 0 : index
    %c0_4 = arith.constant 0 : index
    %3 = vector.load %arg4[%c0_3, %c0_4] : memref<1x128xf32, #tpu.memory_space<vmem>>, vector<1x128xf32>
    %4 = vector.broadcast %3 : vector<1x128xf32> to vector<8x128xf32>
    %5 = arith.addf %2, %4 : vector<8x128xf32>
    %cst_5 = arith.constant 0.000000e+00 : f32
    %6 = vector.broadcast %cst_5 : f32 to vector<8x128xf32>
    %7 = arith.maximumf %5, %6 : vector<8x128xf32>
    %8 = math.absf %5 : vector<8x128xf32>
    %cst_6 = arith.constant 0.000000e+00 : f32
    %9 = vector.broadcast %cst_6 : f32 to vector<8x128xf32>
    %10 = arith.subf %9, %8 : vector<8x128xf32>
    %11 = math.exp %10 : vector<8x128xf32>
    %12 = math.log1p %11 : vector<8x128xf32>
    %13 = arith.addf %7, %12 : vector<8x128xf32>
    %c0_7 = arith.constant 0 : index
    %c0_8 = arith.constant 0 : index
    %14 = vector.load %arg5[%c0_7, %c0_8] : memref<8x128xf32, #tpu.memory_space<vmem>>, vector<8x128xf32>
    tpu.vector_store %arg5[%c0_7, %c0_8], %13 {strides = array<i32>} : memref<8x128xf32, #tpu.memory_space<vmem>>, vector<8x128xf32>,
    return
  }
  func.func @transform_0(%arg0: i32, %arg1: i32) -> (i32, i32) {
    %c0_i32 = arith.constant 0 : i32
    %c0_i32_0 = arith.constant 0 : i32
    return %arg0, %c0_i32 : i32, i32
  }
  func.func @transform_1(%arg0: i32, %arg1: i32) -> (i32, i32) {
    %c0_i32 = arith.constant 0 : i32
    %c0_i32_0 = arith.constant 0 : i32
    return %c0_i32, %arg1 : i32, i32
  }
  func.func @transform_2(%arg0: i32, %arg1: i32) -> (i32, i32) {
    %c0_i32 = arith.constant 0 : i32
    %c0_i32_0 = arith.constant 0 : i32
    return %c0_i32, %arg1 : i32, i32
  }
  func.func @transform_3(%arg0: i32, %arg1: i32) -> (i32, i32) {
    %c0_i32 = arith.constant 0 : i32
    return %arg0, %arg1 : i32, i32
  }
}

</mosaic_0001>

<bundles_post_ra>
// kernel: tpu_custom_call.1
= control target key start
LH: loop header
LB: loop body
LE: loop exit
PB: predicated region body
PF: predicated region fallthrough
CT: control target
= control target key end

     0   :  { %8 = vsyncpa [#allocation3], 0  ;;  %s827_s0 = inlined_call_operand.hbm [shape: f32[16,32], index: 0, kind: input, shape index: {}]   ;;  %s828_s1 = inlined_call_operand.hbm [shape: f32[32,128], index: 1, kind: input, shape index: {}]   ;;  %s829_s2 = inlined_call_operand.vmem [shape: f32[1,128], index: 2, kind: input, shape index: {}]   ;;  %s830_s3 = inlined_call_operand.hbm [shape: f32[16,128], index: 3, kind: output, shape index: {}]  }
   0x1   :  { %10 = vsyncpa [#allocation3 + $0x1], 0 }
   0x2   :  { %11 = vsyncpa [#allocation6], 0 }
   0x3   :  { %12 = vsyncpa [#allocation4], 0 }
   0x4   :  { %14 = vsyncpa [#allocation4 + $0x1], 0  ;;  %s677_s12 = smov 0   ;;  %s679_s13 = smov 0  }
   0x5   :  { %s681_s14 = smov 0   ;;  %s683_s15 = smov 0  }
   0x6   :  { %s685_s16 = smov 0   ;;  %s687_s17 = smov 0  }
   0x7 LB: > { %s409_s18 = sadd.s32 4294967295, %s652_s17   ;;  %p411_p0 = scmp.ge.s32.totalorder %s652_s17, 1  ;;  %s652_s17 = sphi %s687_s17, %s20_s17   ;;  %s648_s16 = sphi %s685_s16, %s841_s16   ;;  %s644_s15 = sphi %s683_s15, %s840_s15   ;;  %s640_s14 = sphi %s681_s14, %s839_s14   ;;  %s636_s13 = sphi %s679_s13, %s838_s13   ;;  %s632_s12 = sphi %s677_s12, %s837_s12  }
   0x8   : > { %p709_p1 = scmp.eq.s32.totalorder %s409_s18, 0  ;;  %p143_p2 = scmp.lt.s32.totalorder %s652_s17, 3 }
   0x9   : > { %s156_s22 = sshll.u32 %s828_s1, 4  ;;  %s654_s24 = smov [#allocation5]   ;;  %s157_s22 = int_to_ptr.hbm [resolvable:$true] %s156_s22 }
   0xa   : > { %p717_p3 = pnand %p411_p0, %p143_p2  ;;  %s158_s25 = sshll.u32 %s654_s24, 4  ;;  %s159_s25 = int_to_ptr.vmem [resolvable:$true] %s158_s25 }
   0xb   : > { %p414_p6 = scmp.ge.s32.totalorder %s652_s17, 2  ;;  %s655_s26 = smov 128  }
   0xc   : > { %p434_p4 = pneg %p717_p3  ;;  %s656_s27 = smov 8  }
   0xd   : > { %s410_s28 = sadd.s32 4294967294, %s652_s17   ;;  %s32_s29 = sadd.s32 1, %s648_s16 }
   0xe   : > { %p435_p5 = pnand %p434_p4, %p709_p1  ;;  %s39_s30 = sadd.s32 1, %s640_s14 }
   0xf   : > { %p34_p7 = scmp.ge.s32.totalorder %s32_s29, 2  ;;  %p46_p8 = scmp.ne.s32.totalorder %s640_s14, %s636_s13 }
  0x10   : > { %437 = dma.hbm_to_vmem [thread:$0]  (!%p435_p5), %s157_s22, 512, %s159_s25, [#allocation6], %s655_s26, %s655_s26, %s656_s27  }
  0x11   : > { %p47_p9 = scmp.eq.s32.totalorder %s652_s17, 0  ;;  %p52_p10 = scmp.ne.s32.totalorder %s636_s13, %s632_s12 }
  0x12   : > { %s843_s29 = smov (%p34_p7, %s32_s29), 0  ;;  %p130_p13 = scmp.eq.s32.totalorder %s409_s18, 1 }
  0x13   : > { %p736_p11 = por %p47_p9, %p46_p8  ;;  %p742_p12 = por %p709_p1, %p52_p10 }
  0x14   : > { %s36_s6 = ssub.s32 %s648_s16, %s843_s29  ;;  %p136_p2 = scmp.eq.s32.totalorder %s410_s28, 1 }
  0x15   : > { %p37_p0 = scmp.eq.s32.totalorder %s36_s6, 0  ;;  %p748_p4 = por %p130_p13, %p46_p8 }
  0x16   : > { %p447_p5 = scmp.lt.s32.totalorder %s652_s17, 2  ;;  %p756_p7 = por %p136_p2, %p52_p10 }
  0x17   : > { %s754_s8 = scalar_select %p37_p0, %s640_s14, %s39_s30  }
  0x18   : > { %s178_s10 = sand.u32 1, %s640_s14   ;;  %s416_s20 = sshll.u32 %s648_s16, 3 }
  0x19   : > { %s415_s11 = sshll.u32 %s178_s10, 3  ;;  %s186_s18 = scalar_lea.hbm %s827_s0, %s416_s20 }
  0x1a   : > { %s182_s24 = scalar_lea.vmem [#allocation2], %s415_s11  ;;  %s188_s26 = sshll.u32 %s186_s18, 4  ;;  %s189_s26 = int_to_ptr.hbm [resolvable:$true] %s188_s26 }
  0x1b   : > { %s190_s25 = sshll.u32 %s182_s24, 4  ;;  %p439_p8 = pnand %p447_p5, %p736_p11  ;;  %s191_s25 = int_to_ptr.vmem [resolvable:$true] %s190_s25 }
  0x1c   : > { %s179_s27 = scalar_lea.sflag [#allocation3], %s178_s10  ;;  %199 = sbr.rel (%p717_p3) target bundleno = 202 (0xca), region = 32 }
  0x1d   : > { %441 = dma.hbm_to_vmem [thread:$0]  (!%p439_p8), %s189_s26, 128, %s191_s25, %s179_s27  }
  0x1e   : > { %s770_s28 = sand.u32 (!%p717_p3), 1, %s636_s13  }
  0x1f   : > { %s418_s30 = sshll.u32 (!%p717_p3), %s770_s28, 3  ;;  %s202_s6 = scalar_lea.sflag (!%p717_p3), [#allocation3], %s770_s28 }
  0x20   : > { %s205_s11 = scalar_lea.vmem (!%p717_p3), [#allocation2], %s418_s30 }
  0x21   : > { %619 = dma.done.wait (%p742_p12), %s202_s6, 128  }
  0x22   : > { %621 = vsyncadd (%p742_p12), %s202_s6, 4294967168 }
  0x23   : > { %623 = dma.done.wait (%p709_p1), [#allocation6], 512  }
  0x24   : > { %625 = vsyncadd (%p709_p1), [#allocation6], 4294966784  ;;  %v244_v0 = vld [vmem:[#allocation5 + $0x18] sm:$0xff]  ;;  %v243_v1 = vld [vmem:[#allocation5 + $0x10] sm:$0xff]  ;;  %vm249_vm0 = vcmask 261120   ;;  %s423_s19 = sshll.u32 %s644_s15, 3 }
  0x25   : > { %265 = vmatpush.msra.mxu0 %v244_v0  ;;  %v242_v2 = vld [vmem:[#allocation5 + $0x8] sm:$0xff]  ;;  %v241_v3 = vld [vmem:[#allocation5] sm:$0xff]  ;;  %v240_v4 = vld [vmem:[%s205_s11] sm:$0xff]  ;;  %s301_s20 = scalar_lea.hbm %s830_s3, %s423_s19  ;;  %s236_s21 = scalar_lea.vmem [#allocation7], %s418_s30 }
  0x26   : > { %v501_v5 = vld [vmem:[%s829_s2] ss:$0 sm:$0xff]  ;;  %s303_s22 = sshll.u32 %s236_s21, 4  ;;  %s305_s18 = sshll.u32 %s301_s20, 4  ;;  %s304_s22 = int_to_ptr.vmem [resolvable:$true] %s303_s22  ;;  %s306_s18 = int_to_ptr.hbm [resolvable:$true] %s305_s18 }
  0x27   : > { %266 = vmatpush.msra.mxu0 %v243_v1  ;;  %s290_s15 = scalar_lea.sflag [#allocation4], %s770_s28  ;;  %s580_s24 = sshra.s32 %s306_s18, 4  ;;  %s581_s24 = int_to_ptr.hbm [resolvable:$true] %s580_s24 }
  0x28   : > { %s582_s25 = scalar_lea.hbm %s581_s24, 8  ;;  %s586_s30 = scalar_lea.hbm %s830_s3, 16 }
  0x29   : > { %267 = vmatpush.msra.mxu0 %v242_v2  ;;  %p583_p1 = scmp.ne.s32.totalorder %s581_s24, %s582_s25  ;;  %p587_p10 = scmp.lt.s32.totalorder %s581_s24, %s830_s3 }
  0x2a   : > { %p588_p11 = scmp.lt.s32.totalorder %s586_s30, %s582_s25 }
  0x2b   : > { %268 = vmatpush.msra.mxu0 %v241_v3  ;;  %p584_p3 = pnand %p583_p1, %p748_p4 }
  0x2c   : > { %421 = vmatmul.msk.f32.vlgmr.msra.gmra.mxu0 %vm249_vm0, %v240_v4  ;;  %p589_p12 = por %p588_p11, %p587_p10 }
  0x2d   : > { %p585_p9 = pneg %p584_p3 }
  0x2f   : > { %p590_p13 = pnand %p589_p12, %p585_p9 }
  0xa9   : > { %v270_v6 = vpop.f32.mrf.mxu0 }
  0xaa   : > { %v271_v7 = vadd.f32 %v501_v5, %v270_v6 }
  0xac   : > { %v274_v8 = vand.u32 2147483647, %v271_v7  ;;  %v273_v19 = vmax.f32 %v271_v7, 0.0 }
  0xae   : > { %v275_v9 = vsub.f32 0.0, %v274_v8 }
  0xb0   : > { %v276_v10 = vmul.f32 1.442695, %v275_v9 }
  0xb2   : > { %502 = vpow2.f32 %v276_v10 }
  0xb8   : > { %v503_v11 = vpop.eup %502 }
  0xb9   : > { %v278_v12 = vadd.f32 1.0, %v503_v11  ;;  %v281_v13 = vmul.f32 -0.5, %v503_v11  ;;  %v284_v15 = vand.u32 2147483647, %v503_v11 }
  0xbb   : > { %504 = vlog2.f32 %v278_v12  ;;  %v282_v14 = vadd.f32 1.0, %v281_v13  ;;  %vm285_vm1 = vcmp.lt.f32.partialorder %v284_v15, 0.0004427343 }
  0xbd   : > { %v283_v18 = vmul.f32 %v503_v11, %v282_v14 }
  0xc1   : > { %v505_v16 = vpop.eup %504 }
  0xc2   : > { %v280_v17 = vmul.f32 0.6931472, %v505_v16 }
  0xc4   : > { %v286_v20 = vsel %vm285_vm1, %v283_v18, %v280_v17 }
  0xc5   : > { %v287_v21 = vadd.f32 %v286_v20, %v273_v19 }
  0xc7   : > { %288 = vst [vmem:[%s236_s21] sm:$0xff] %v287_v21 }
  0xc8   : > { %593 = shalt.err (!%p590_p13)
}
  0xc9   : > { %432 = dma.vmem_to_hbm [thread:$0]  (%p748_p4), %s304_s22, 128, %s306_s18, %s290_s15  }
  0xca PF: > { %s317_s28 = sand.u32 1, %s632_s12   ;;  %p443_p0 = pnand %p414_p6, %p756_p7 }
  0xcb   : > { %s318_s23 = scalar_lea.sflag [#allocation4], %s317_s28 }
  0xcc   : > { %p444_p2 = pneg %p443_p0 }
  0xce   : > { %627 = dma.done.wait (%p444_p2), %s318_s23, 128  }
  0xcf   : > { %629 = vsyncadd (%p444_p2), %s318_s23, 4294967168  ;;  %s20_s17 = sadd.s32 1, %s652_s17   ;;  %s837_s12 = smov %s636_s13 }
  0xd0   : > { %p17_p5 = scmp.ge.s32.totalorder %s20_s17, 4   ;;  %s838_s13 = smov %s640_s14 }
  0xd1   : > { %s839_s14 = smov %s754_s8  ;;  %s840_s15 = smov %s648_s16 }
  0xd2   : > { %s841_s16 = smov %s843_s29  ;;  %19 = sbr.rel (!%p17_p5) target bundleno = 7 (0x7), region = 85 }
  0xd7   :  { %324 = vsyncpa [#allocation3], 1 }
  0xd8   :  { %326 = vsyncpa [#allocation3 + $0x1], 1 }
  0xd9   :  { %327 = vsyncpa [#allocation6], 1 }
  0xda   :  { %328 = vsyncpa [#allocation4], 1 }
  0xdb   :  { %330 = vsyncpa [#allocation4 + $0x1], 1 }

// kernel: tpu_custom_call.1
= control target key start
LH: loop header
LB: loop body
LE: loop exit
PB: predicated region body
PF: predicated region fallthrough
CT: control target
= control target key end

     0   :  { %8 = vsyncpa [#allocation3], 0  ;;  %s827_s0 = inlined_call_operand.hbm [shape: f32[16,32], index: 0, kind: input, shape index: {}]   ;;  %s828_s1 = inlined_call_operand.hbm [shape: f32[32,128], index: 1, kind: input, shape index: {}]   ;;  %s829_s2 = inlined_call_operand.vmem [shape: f32[1,128], index: 2, kind: input, shape index: {}]   ;;  %s830_s3 = inlined_call_operand.hbm [shape: f32[16,128], index: 3, kind: output, shape index: {}]  }
   0x1   :  { %10 = vsyncpa [#allocation3 + $0x1], 0 }
   0x2   :  { %11 = vsyncpa [#allocation6], 0 }
   0x3   :  { %12 = vsyncpa [#allocation4], 0 }
   0x4   :  { %14 = vsyncpa [#allocation4 + $0x1], 0  ;;  %s677_s12 = smov 0   ;;  %s679_s13 = smov 0  }
   0x5   :  { %s681_s14 = smov 0   ;;  %s683_s15 = smov 0  }
   0x6   :  { %s685_s16 = smov 0   ;;  %s687_s17 = smov 0  }
   0x7 LB: > { %s409_s18 = sadd.s32 4294967295, %s652_s17   ;;  %p411_p0 = scmp.ge.s32.totalorder %s652_s17, 1  ;;  %s652_s17 = sphi %s687_s17, %s20_s17   ;;  %s648_s16 = sphi %s685_s16, %s841_s16   ;;  %s644_s15 = sphi %s683_s15, %s840_s15   ;;  %s640_s14 = sphi %s681_s14, %s839_s14   ;;  %s636_s13 = sphi %s679_s13, %s838_s13   ;;  %s632_s12 = sphi %s677_s12, %s837_s12  }
   0x8   : > { %p709_p1 = scmp.eq.s32.totalorder %s409_s18, 0  ;;  %p143_p2 = scmp.lt.s32.totalorder %s652_s17, 3 }
   0x9   : > { %s156_s22 = sshll.u32 %s828_s1, 4  ;;  %s654_s24 = smov [#allocation5]   ;;  %s157_s22 = int_to_ptr.hbm [resolvable:$true] %s156_s22 }
   0xa   : > { %p717_p3 = pnand %p411_p0, %p143_p2  ;;  %s158_s25 = sshll.u32 %s654_s24, 4  ;;  %s159_s25 = int_to_ptr.vmem [resolvable:$true] %s158_s25 }
   0xb   : > { %p414_p6 = scmp.ge.s32.totalorder %s652_s17, 2  ;;  %s655_s26 = smov 128  }
   0xc   : > { %p434_p4 = pneg %p717_p3  ;;  %s656_s27 = smov 8  }
   0xd   : > { %s410_s28 = sadd.s32 4294967294, %s652_s17   ;;  %s32_s29 = sadd.s32 1, %s648_s16 }
   0xe   : > { %p435_p5 = pnand %p434_p4, %p709_p1  ;;  %s39_s30 = sadd.s32 1, %s640_s14 }
   0xf   : > { %p34_p7 = scmp.ge.s32.totalorder %s32_s29, 2  ;;  %p46_p8 = scmp.ne.s32.totalorder %s640_s14, %s636_s13 }
  0x10   : > { %437 = dma.hbm_to_vmem [thread:$0]  (!%p435_p5), %s157_s22, 512, %s159_s25, [#allocation6], %s655_s26, %s655_s26, %s656_s27  }
  0x11   : > { %p47_p9 = scmp.eq.s32.totalorder %s652_s17, 0  ;;  %p52_p10 = scmp.ne.s32.totalorder %s636_s13, %s632_s12 }
  0x12   : > { %s843_s29 = smov (%p34_p7, %s32_s29), 0  ;;  %p130_p13 = scmp.eq.s32.totalorder %s409_s18, 1 }
  0x13   : > { %p736_p11 = por %p47_p9, %p46_p8  ;;  %p742_p12 = por %p709_p1, %p52_p10 }
  0x14   : > { %s36_s6 = ssub.s32 %s648_s16, %s843_s29  ;;  %p136_p2 = scmp.eq.s32.totalorder %s410_s28, 1 }
  0x15   : > { %p37_p0 = scmp.eq.s32.totalorder %s36_s6, 0  ;;  %p748_p4 = por %p130_p13, %p46_p8 }
  0x16   : > { %p447_p5 = scmp.lt.s32.totalorder %s652_s17, 2  ;;  %p756_p7 = por %p136_p2, %p52_p10 }
  0x17   : > { %s754_s8 = scalar_select %p37_p0, %s640_s14, %s39_s30  }
  0x18   : > { %s178_s10 = sand.u32 1, %s640_s14   ;;  %s416_s20 = sshll.u32 %s648_s16, 3 }
  0x19   : > { %s415_s11 = sshll.u32 %s178_s10, 3  ;;  %s186_s18 = scalar_lea.hbm %s827_s0, %s416_s20 }
  0x1a   : > { %s182_s24 = scalar_lea.vmem [#allocation2], %s415_s11  ;;  %s188_s26 = sshll.u32 %s186_s18, 4  ;;  %s189_s26 = int_to_ptr.hbm [resolvable:$true] %s188_s26 }
  0x1b   : > { %s190_s25 = sshll.u32 %s182_s24, 4  ;;  %p439_p8 = pnand %p447_p5, %p736_p11  ;;  %s191_s25 = int_to_ptr.vmem [resolvable:$true] %s190_s25 }
  0x1c   : > { %s179_s27 = scalar_lea.sflag [#allocation3], %s178_s10  ;;  %199 = sbr.rel (%p717_p3) target bundleno = 202 (0xca), region = 32 }
  0x1d   : > { %441 = dma.hbm_to_vmem [thread:$0]  (!%p439_p8), %s189_s26, 128, %s191_s25, %s179_s27  }
  0x1e   : > { %s770_s28 = sand.u32 (!%p717_p3), 1, %s636_s13  }
  0x1f   : > { %s418_s30 = sshll.u32 (!%p717_p3), %s770_s28, 3  ;;  %s202_s6 = scalar_lea.sflag (!%p717_p3), [#allocation3], %s770_s28 }
  0x20   : > { %s205_s11 = scalar_lea.vmem (!%p717_p3), [#allocation2], %s418_s30 }
  0x21   : > { %619 = dma.done.wait (%p742_p12), %s202_s6, 128  }
  0x22   : > { %621 = vsyncadd (%p742_p12), %s202_s6, 4294967168 }
  0x23   : > { %623 = dma.done.wait (%p709_p1), [#allocation6], 512  }
  0x24   : > { %625 = vsyncadd (%p709_p1), [#allocation6], 4294966784  ;;  %v244_v0 = vld [vmem:[#allocation5 + $0x18] sm:$0xff]  ;;  %v243_v1 = vld [vmem:[#allocation5 + $0x10] sm:$0xff]  ;;  %vm249_vm0 = vcmask 261120   ;;  %s423_s19 = sshll.u32 %s644_s15, 3 }
  0x25   : > { %265 = vmatpush.msra.mxu0 %v244_v0  ;;  %v242_v2 = vld [vmem:[#allocation5 + $0x8] sm:$0xff]  ;;  %v241_v3 = vld [vmem:[#allocation5] sm:$0xff]  ;;  %v240_v4 = vld [vmem:[%s205_s11] sm:$0xff]  ;;  %s301_s20 = scalar_lea.hbm %s830_s3, %s423_s19  ;;  %s236_s21 = scalar_lea.vmem [#allocation7], %s418_s30 }
  0x26   : > { %v501_v5 = vld [vmem:[%s829_s2] ss:$0 sm:$0xff]  ;;  %s303_s22 = sshll.u32 %s236_s21, 4  ;;  %s305_s18 = sshll.u32 %s301_s20, 4  ;;  %s304_s22 = int_to_ptr.vmem [resolvable:$true] %s303_s22  ;;  %s306_s18 = int_to_ptr.hbm [resolvable:$true] %s305_s18 }
  0x27   : > { %266 = vmatpush.msra.mxu0 %v243_v1  ;;  %s290_s15 = scalar_lea.sflag [#allocation4], %s770_s28  ;;  %s580_s24 = sshra.s32 %s306_s18, 4  ;;  %s581_s24 = int_to_ptr.hbm [resolvable:$true] %s580_s24 }
  0x28   : > { %s582_s25 = scalar_lea.hbm %s581_s24, 8  ;;  %s586_s30 = scalar_lea.hbm %s830_s3, 16 }
  0x29   : > { %267 = vmatpush.msra.mxu0 %v242_v2  ;;  %p583_p1 = scmp.ne.s32.totalorder %s581_s24, %s582_s25  ;;  %p587_p10 = scmp.lt.s32.totalorder %s581_s24, %s830_s3 }
  0x2a   : > { %p588_p11 = scmp.lt.s32.totalorder %s586_s30, %s582_s25 }
  0x2b   : > { %268 = vmatpush.msra.mxu0 %v241_v3  ;;  %p584_p3 = pnand %p583_p1, %p748_p4 }
  0x2c   : > { %421 = vmatmul.msk.f32.vlgmr.msra.gmra.mxu0 %vm249_vm0, %v240_v4  ;;  %p589_p12 = por %p588_p11, %p587_p10 }
  0x2d   : > { %p585_p9 = pneg %p584_p3 }
  0x2f   : > { %p590_p13 = pnand %p589_p12, %p585_p9 }
  0xa9   : > { %v270_v6 = vpop.f32.mrf.mxu0 }
  0xaa   : > { %v271_v7 = vadd.f32 %v501_v5, %v270_v6 }
  0xac   : > { %v274_v8 = vand.u32 2147483647, %v271_v7  ;;  %v273_v19 = vmax.f32 %v271_v7, 0.0 }
  0xae   : > { %v275_v9 = vsub.f32 0.0, %v274_v8 }
  0xb0   : > { %v276_v10 = vmul.f32 1.442695, %v275_v9 }
  0xb2   : > { %502 = vpow2.f32 %v276_v10 }
  0xb8   : > { %v503_v11 = vpop.eup %502 }
  0xb9   : > { %v278_v12 = vadd.f32 1.0, %v503_v11  ;;  %v281_v13 = vmul.f32 -0.5, %v503_v11  ;;  %v284_v15 = vand.u32 2147483647, %v503_v11 }
  0xbb   : > { %504 = vlog2.f32 %v278_v12  ;;  %v282_v14 = vadd.f32 1.0, %v281_v13  ;;  %vm285_vm1 = vcmp.lt.f32.partialorder %v284_v15, 0.0004427343 }
  0xbd   : > { %v283_v18 = vmul.f32 %v503_v11, %v282_v14 }
  0xc1   : > { %v505_v16 = vpop.eup %504 }
  0xc2   : > { %v280_v17 = vmul.f32 0.6931472, %v505_v16 }
  0xc4   : > { %v286_v20 = vsel %vm285_vm1, %v283_v18, %v280_v17 }
  0xc5   : > { %v287_v21 = vadd.f32 %v286_v20, %v273_v19 }
  0xc7   : > { %288 = vst [vmem:[%s236_s21] sm:$0xff] %v287_v21 }
  0xc8   : > { %593 = shalt.err (!%p590_p13)
}
  0xc9   : > { %432 = dma.vmem_to_hbm [thread:$0]  (%p748_p4), %s304_s22, 128, %s306_s18, %s290_s15  }
  0xca PF: > { %s317_s28 = sand.u32 1, %s632_s12   ;;  %p443_p0 = pnand %p414_p6, %p756_p7 }
  0xcb   : > { %s318_s23 = scalar_lea.sflag [#allocation4], %s317_s28 }
  0xcc   : > { %p444_p2 = pneg %p443_p0 }
  0xce   : > { %627 = dma.done.wait (%p444_p2), %s318_s23, 128  }
  0xcf   : > { %629 = vsyncadd (%p444_p2), %s318_s23, 4294967168  ;;  %s20_s17 = sadd.s32 1, %s652_s17   ;;  %s837_s12 = smov %s636_s13 }
  0xd0   : > { %p17_p5 = scmp.ge.s32.totalorder %s20_s17, 4   ;;  %s838_s13 = smov %s640_s14 }
  0xd1   : > { %s839_s14 = smov %s754_s8  ;;  %s840_s15 = smov %s648_s16 }
  0xd2   : > { %s841_s16 = smov %s843_s29  ;;  %19 = sbr.rel (!%p17_p5) target bundleno = 7 (0x7), region = 85 }
  0xd7   :  { %324 = vsyncpa [#allocation3], 1 }
  0xd8   :  { %326 = vsyncpa [#allocation3 + $0x1], 1 }
  0xd9   :  { %327 = vsyncpa [#allocation6], 1 }
  0xda   :  { %328 = vsyncpa [#allocation4], 1 }
  0xdb   :  { %330 = vsyncpa [#allocation4 + $0x1], 1 }

</bundles_post_ra>
